<compile_context>
chip_gen: v6e
topology: v6e:2x2x1
jax: 0.10.0
libtpu: 0.0.40
codegen_flags: <defaults>
</compile_context>

<pallas_src>
import functools
import math

import jax
import jax.numpy as jnp
from jax.experimental import pallas as pl
from jax.experimental.pallas import tpu as pltpu


def _round_up(x, m):
    return ((x + m - 1) // m) * m


# --------------------------------------------------------------------------
# Kernel 1: fused QKV projection   y[TM, 3H] = x[TM, H] @ W[H, 3H] + b[1, 3H]
# --------------------------------------------------------------------------
def _qkv_proj_kernel(x_ref, w_ref, b_ref, o_ref):
    # Keep matmul operands in their native dtype; accumulate in f32 on the MXU.
    acc = jnp.dot(x_ref[...], w_ref[...], preferred_element_type=jnp.float32)
    o_ref[...] = (acc + b_ref[...].astype(jnp.float32)).astype(o_ref.dtype)


# --------------------------------------------------------------------------
# Kernel 2: flash-style attention with online softmax.
# Grid = (B, heads, q_tiles, kv_tiles); kv axis is the reduction ("arbitrary").
# --------------------------------------------------------------------------
def _flash_attn_kernel(q_ref, k_ref, v_ref, mask_ref, o_ref,
                       m_sc, l_sc, acc_sc, *, scale):
    ki = pl.program_id(3)

    @pl.when(ki == 0)
    def _():
        m_sc[...] = jnp.full_like(m_sc, -jnp.inf)
        l_sc[...] = jnp.zeros_like(l_sc)
        acc_sc[...] = jnp.zeros_like(acc_sc)

    q = q_ref[0, 0]          # (TQ, dH)
    k = k_ref[0, 0]          # (TK, dH)
    v = v_ref[0, 0]          # (TK, dH)

    # scores tile (TQ, TK) = q @ k^T with f32 accumulation
    s = jax.lax.dot_general(q, k, (((1,), (1,)), ((), ())),
                            preferred_element_type=jnp.float32)
    # scale then add the (finite, large-negative for masked/padded kv) additive mask
    s = s * scale + mask_ref[0].astype(jnp.float32)          # (1, TK) broadcasts over rows

    m_prev = m_sc[...]
    m_new = jnp.maximum(m_prev, s.max(axis=-1, keepdims=True))
    alpha = jnp.exp(m_prev - m_new)
    p = jnp.exp(s - m_new)
    # NOTE: attention dropout is identity in eval mode (attention_probs_dropout_prob unused).
    l_sc[...] = alpha * l_sc[...] + p.sum(axis=-1, keepdims=True)
    acc_sc[...] = alpha * acc_sc[...] + jnp.dot(p.astype(v.dtype), v,
                                                preferred_element_type=jnp.float32)
    m_sc[...] = m_new

    @pl.when(ki == pl.num_programs(3) - 1)
    def _():
        # exact division only in the epilogue (once per q tile) to match the reference
        o_ref[0, 0] = (acc_sc[...] / l_sc[...]).astype(o_ref.dtype)


# --------------------------------------------------------------------------
# Wrapper
# --------------------------------------------------------------------------
def transformer_self_attention(hidden_states, attention_mask, params, *,
                               num_attention_heads,
                               block_m=256, block_s=128,
                               vmem_limit_bytes=48 * 1024 * 1024):
    """hidden_states: [B, S, H]; attention_mask: additive mask [B, 1, 1, S] (or [B, S]).

    params: q_w/k_w/v_w in torch nn.Linear layout ([out, in] = [H, H]) and q_b/k_b/v_b ([H]).
    Returns context_layer [B, S, H] (eval mode).
    """
    # TODO(synk): head_mask scaling of attention_probs and output_attentions=True
    # (materializing probs) are not implemented in the online-softmax formulation.
    B, S, H = hidden_states.shape
    nH = num_attention_heads
    assert H % nH == 0, "hidden size must be a multiple of num_attention_heads"
    dH = H // nH
    dtype = hidden_states.dtype

    # ---- tile sizes (clamped for small inputs; multiples of 8 sublanes) ----
    block_s = min(block_s, _round_up(S, 8))
    S_pad = _round_up(S, block_s)
    M = B * S_pad
    block_m = min(block_m, _round_up(M, 8))
    M_pad = _round_up(M, block_m)

    # ---- pad sequence / rows; padded kv positions are killed by the additive mask ----
    x = jnp.pad(hidden_states, ((0, 0), (0, S_pad - S), (0, 0)))
    x2 = jnp.pad(x.reshape(M, H), ((0, M_pad - M), (0, 0)))

    # fused QKV weight: [H_in, 3*H_out] so the kernel does a plain row-major matmul
    w_qkv = jnp.concatenate(
        [params["q_w"].T, params["k_w"].T, params["v_w"].T], axis=1)
    b_qkv = jnp.concatenate(
        [params["q_b"], params["k_b"], params["v_b"]]).reshape(1, 3 * H)

    qkv = pl.pallas_call(
        _qkv_proj_kernel,
        out_shape=jax.ShapeDtypeStruct((M_pad, 3 * H), dtype),
        grid_spec=pltpu.PrefetchScalarGridSpec(
            num_scalar_prefetch=0,
            grid=(M_pad // block_m,),
            in_specs=[
                pl.BlockSpec((block_m, H), lambda i: (i, 0)),   # activation row tile
                pl.BlockSpec((H, 3 * H), lambda i: (0, 0)),     # weight: constant index -> resident
                pl.BlockSpec((1, 3 * H), lambda i: (0, 0)),     # bias
            ],
            out_specs=pl.BlockSpec((block_m, 3 * H), lambda i: (i, 0)),
        ),
        compiler_params=pltpu.CompilerParams(
            dimension_semantics=("parallel",),
            vmem_limit_bytes=vmem_limit_bytes),
    )(x2, w_qkv, b_qkv)

    qkv = qkv[:M]

    def to_heads(t):  # [M, H] -> [B, nH, S_pad, dH]
        return t.reshape(B, S_pad, nH, dH).transpose(0, 2, 1, 3)

    q = to_heads(qkv[:, :H])
    k = to_heads(qkv[:, H:2 * H])
    v = to_heads(qkv[:, 2 * H:])

    # ---- additive attention mask -> [B, 1, S_pad]; padded kv get a big finite negative ----
    am = jnp.asarray(attention_mask)
    if am.ndim == 4:          # standard extended mask [B, 1, 1, S]
        am = am.reshape(B, S)
    am = jnp.pad(am.astype(jnp.float32), ((0, 0), (0, S_pad - S)),
                 constant_values=-1e9).reshape(B, 1, S_pad)

    n_s = S_pad // block_s
    scale = 1.0 / math.sqrt(dH)

    ctx = pl.pallas_call(
        functools.partial(_flash_attn_kernel, scale=scale),
        out_shape=jax.ShapeDtypeStruct((B, nH, S_pad, dH), dtype),
        grid_spec=pltpu.PrefetchScalarGridSpec(
            num_scalar_prefetch=0,
            grid=(B, nH, n_s, n_s),
            in_specs=[
                pl.BlockSpec((1, 1, block_s, dH), lambda b, h, qi, ki: (b, h, qi, 0)),  # q
                pl.BlockSpec((1, 1, block_s, dH), lambda b, h, qi, ki: (b, h, ki, 0)),  # k
                pl.BlockSpec((1, 1, block_s, dH), lambda b, h, qi, ki: (b, h, ki, 0)),  # v
                pl.BlockSpec((1, 1, block_s), lambda b, h, qi, ki: (b, 0, ki)),         # mask
            ],
            out_specs=pl.BlockSpec((1, 1, block_s, dH),
                                   lambda b, h, qi, ki: (b, h, qi, 0)),
            scratch_shapes=[
                pltpu.VMEM((block_s, 1), jnp.float32),    # running max
                pltpu.VMEM((block_s, 1), jnp.float32),    # running denominator
                pltpu.VMEM((block_s, dH), jnp.float32),   # output accumulator
            ],
        ),
        compiler_params=pltpu.CompilerParams(
            dimension_semantics=("parallel", "parallel", "parallel", "arbitrary"),
            vmem_limit_bytes=vmem_limit_bytes),
    )(q, k, v, am)

    # merge heads: [B, nH, S_pad, dH] -> [B, S, H]
    return ctx.transpose(0, 2, 1, 3).reshape(B, S_pad, H)[:, :S, :]


# --------------------------------------------------------------------------
# Pure-JAX reference (mirrors the PyTorch forward, eval mode)
# --------------------------------------------------------------------------
def _reference(hidden_states, attention_mask, params, *, num_attention_heads):
    B, S, H = hidden_states.shape
    nH = num_attention_heads
    dH = H // nH

    def proj(w, b):
        y = hidden_states @ w.T + b
        return y.reshape(B, S, nH, dH).transpose(0, 2, 1, 3)

    q = proj(params["q_w"], params["q_b"])
    k = proj(params["k_w"], params["k_b"])
    v = proj(params["v_w"], params["v_b"])
    scores = jnp.einsum("bhqd,bhkd->bhqk", q, k) / math.sqrt(dH)
    scores = scores + attention_mask
    probs = jax.nn.softmax(scores, axis=-1)
    ctx = jnp.einsum("bhqk,bhkd->bhqd", probs, v)
    return ctx.transpose(0, 2, 1, 3).reshape(B, S, H)


if __name__ == "__main__":
    # hidden=128 keeps every lane axis >= 128 (lane-dense stores); heads=4 -> head_dim=32
    B, S, H, NH = 2, 8, 128, 4
    key = jax.random.PRNGKey(0)
    k1, k2, k3, k4, k5, k6, k7 = jax.random.split(key, 7)

    hidden_states = jax.random.normal(k1, (B, S, H), dtype=jnp.float32)

    # BERT-style additive mask built from per-example valid lengths
    lengths = jnp.array([S, 5], dtype=jnp.int32)
    valid = (jnp.arange(S)[None, :] < lengths[:, None]).astype(jnp.float32)
    attention_mask = (1.0 - valid)[:, None, None, :] * -10000.0      # [B, 1, 1, S]

    bound = 1.0 / math.sqrt(H)
    params = {
        "q_w": jax.random.uniform(k2, (H, H), jnp.float32, -bound, bound),
        "q_b": jax.random.uniform(k3, (H,), jnp.float32, -bound, bound),
        "k_w": jax.random.uniform(k4, (H, H), jnp.float32, -bound, bound),
        "k_b": jax.random.uniform(k5, (H,), jnp.float32, -bound, bound),
        "v_w": jax.random.uniform(k6, (H, H), jnp.float32, -bound, bound),
        "v_b": jax.random.uniform(k7, (H,), jnp.float32, -bound, bound),
    }

    out = transformer_self_attention(hidden_states, attention_mask, params,
                                     num_attention_heads=NH)
    out = jax.block_until_ready(out)

    ref = _reference(hidden_states, attention_mask, params, num_attention_heads=NH)
    assert out.shape == (B, S, H)
    assert jnp.allclose(out, ref, atol=1e-4, rtol=1e-4), "mismatch vs reference"

    print("KERNEL_OK")
</pallas_src>

<mosaic_0001>
module attributes {stable_mosaic.version = 11 : i64} {
  func.func @_qkv_proj_kernel(%arg0: i32, %arg1: memref<16x128xf32, #tpu.memory_space<vmem>>, %arg2: memref<128x384xf32, #tpu.memory_space<vmem>>, %arg3: memref<1x384xf32, #tpu.memory_space<vmem>>, %arg4: memref<16x384xf32, #tpu.memory_space<vmem>>) attributes {dimension_semantics = [#tpu.dimension_semantics<parallel>], iteration_bounds = array<i64: 1>, scalar_prefetch = 0 : i64, scratch_operands = 0 : i64, tpu.core_type = #tpu.core_type<tc>, window_params = [{transform_indices = @transform_0, window_bounds = array<i64: 16, 128>}, {pipeline_mode = #tpu.pipeline_mode<synchronous>, transform_indices = @transform_1, window_bounds = array<i64: 128, 384>}, {pipeline_mode = #tpu.pipeline_mode<synchronous>, transform_indices = @transform_2, window_bounds = array<i64: 1, 384>}, {transform_indices = @transform_3, window_bounds = array<i64: 16, 384>}]} {
    %c0 = arith.constant 0 : index
    %c0_0 = arith.constant 0 : index
    %0 = vector.load %arg1[%c0, %c0_0] : memref<16x128xf32, #tpu.memory_space<vmem>>, vector<16x128xf32>
    %c0_1 = arith.constant 0 : index
    %c0_2 = arith.constant 0 : index
    %1 = vector.load %arg2[%c0_1, %c0_2] : memref<128x384xf32, #tpu.memory_space<vmem>>, vector<128x384xf32>
    %cst = arith.constant dense<0.000000e+00> : vector<16x384xf32>
    %2 = tpu.matmul %0, %1, %cst {dimension_numbers = #tpu.dot_dimension_numbers<[1], [0], [0], [1], [0, 0, 1, 1], [], []>} : vector<16x128xf32>, vector<128x384xf32>, vector<16x384xf32> -> vector<16x384xf32>
    %c0_3 = arith.constant 0 : index
    %c0_4 = arith.constant 0 : index
    %3 = vector.load %arg3[%c0_3, %c0_4] : memref<1x384xf32, #tpu.memory_space<vmem>>, vector<1x384xf32>
    %4 = vector.broadcast %3 : vector<1x384xf32> to vector<16x384xf32>
    %5 = arith.addf %2, %4 : vector<16x384xf32>
    %c0_5 = arith.constant 0 : index
    %c0_6 = arith.constant 0 : index
    %6 = vector.load %arg4[%c0_5, %c0_6] : memref<16x384xf32, #tpu.memory_space<vmem>>, vector<16x384xf32>
    tpu.vector_store %arg4[%c0_5, %c0_6], %5 {strides = array<i32>} : memref<16x384xf32, #tpu.memory_space<vmem>>, vector<16x384xf32>,
    return
  }
  func.func @transform_0(%arg0: i32) -> (i32, i32) {
    %c0_i32 = arith.constant 0 : i32
    %c0_i32_0 = arith.constant 0 : i32
    return %arg0, %c0_i32 : i32, i32
  }
  func.func @transform_1(%arg0: i32) -> (i32, i32) {
    %c0_i32 = arith.constant 0 : i32
    %c0_i32_0 = arith.constant 0 : i32
    %c0_i32_1 = arith.constant 0 : i32
    return %c0_i32, %c0_i32_0 : i32, i32
  }
  func.func @transform_2(%arg0: i32) -> (i32, i32) {
    %c0_i32 = arith.constant 0 : i32
    %c0_i32_0 = arith.constant 0 : i32
    %c0_i32_1 = arith.constant 0 : i32
    return %c0_i32, %c0_i32_0 : i32, i32
  }
  func.func @transform_3(%arg0: i32) -> (i32, i32) {
    %c0_i32 = arith.constant 0 : i32
    %c0_i32_0 = arith.constant 0 : i32
    return %arg0, %c0_i32 : i32, i32
  }
}

</mosaic_0001>

<bundles_post_ra>
// kernel: tpu_custom_call.1
= control target key start
LH: loop header
LB: loop body
LE: loop exit
PB: predicated region body
PF: predicated region fallthrough
CT: control target
= control target key end

     0   :  { %8 = vsyncpa [#allocation3], 0  ;;  %s461_s0 = inlined_call_operand.hbm [shape: f32[16,128], index: 0, kind: input, shape index: {}]   ;;  %s462_s1 = inlined_call_operand.hbm [shape: f32[128,384], index: 1, kind: input, shape index: {}]   ;;  %s463_s2 = inlined_call_operand.vmem [shape: f32[1,384], index: 2, kind: input, shape index: {}]   ;;  %s464_s3 = inlined_call_operand.hbm [shape: f32[16,384], index: 3, kind: output, shape index: {}]  }
   0x1   :  { %9 = vsyncpa [#allocation6], 0 }
   0x2   :  { %10 = vsyncpa [#allocation4], 0  ;;  %s413_s12 = smov [#allocation2]  }
   0x3   :  { %s16_s13 = sshll.u32 %s413_s12, 4  ;;  %s17_s13 = int_to_ptr.vmem [resolvable:$true] %s16_s13 }
   0x4   :  { %s355_s14 = scalar_lea.vmem %s17_s13, 256  ;;  %p360_p1 = scmp.lt.s32.totalorder %s17_s13, %s17_s13 }
   0x5   :  { %p356_p0 = scmp.ne.s32.totalorder %s17_s13, %s355_s14  ;;  %p361_p2 = scmp.lt.s32.totalorder %s355_s14, %s355_s14 }
   0x7   :  { %p362_p3 = por %p361_p2, %p360_p1 }
   0x9   :  { %p363_p4 = pnand %p362_p3, %p356_p0 }
   0xb   :  { %366 = shalt.err (!%p363_p4)
}
   0xc   :  { %s414_s15 = smov 128   ;;  %s415_s16 = smov 8  }
   0xd   :  { %22 = dma.hbm_to_vmem [thread:$0]  %s461_s0, 256, %s17_s13, [#allocation3], %s414_s15, %s414_s15, %s415_s16  }
   0xe   :  { %s416_s19 = smov [#allocation5]  }
   0xf   :  { %s28_s20 = sshll.u32 %s416_s19, 4  ;;  %s29_s20 = int_to_ptr.vmem [resolvable:$true] %s28_s20 }
  0x10   :  { %s375_s21 = scalar_lea.vmem %s29_s20, 6144  ;;  %p380_p6 = scmp.lt.s32.totalorder %s29_s20, %s29_s20 }
  0x11   :  { %p376_p5 = scmp.ne.s32.totalorder %s29_s20, %s375_s21  ;;  %p381_p7 = scmp.lt.s32.totalorder %s375_s21, %s375_s21 }
  0x13   :  { %p382_p8 = por %p381_p7, %p380_p6 }
  0x15   :  { %p383_p9 = pnand %p382_p8, %p376_p5 }
  0x17   :  { %386 = shalt.err (!%p383_p9)
}
  0x18   :  { %s417_s22 = smov 384   ;;  %s418_s23 = smov 24  }
  0x19   :  { %34 = dma.hbm_to_vmem [thread:$0]  %s462_s1, 6144, %s29_s20, [#allocation6], %s417_s22, %s417_s22, %s418_s23  }
  0x1a   :  { %407 = dma.done.wait [#allocation3], 256  }
  0x1b   :  { %408 = vsyncadd [#allocation3], 4294967040 }
  0x1c   :  { %409 = dma.done.wait [#allocation6], 6144  }
  0x1d   :  { %410 = vsyncadd [#allocation6], 4294961152  ;;  %v419_v0 = vmov 0.0   ;;  %v91_v1 = vld [vmem:[#allocation5 + $0x170] sm:$0xff]  ;;  %v90_v2 = vld [vmem:[#allocation5 + $0x168] sm:$0xff]  ;;  %v95_v51 = vlaneseq  ;;  %s420_s26 = smov [#allocation7]  }
  0x1e   :  { %174 = vmatprep.mubr.f32.mxu0 %v419_v0  ;;  %v88_v3 = vld [vmem:[#allocation5 + $0x158] sm:$0xff]  ;;  %110 = vmatprep.subr.mxu0 %v91_v1  ;;  %v87_v5 = vld [vmem:[#allocation5 + $0x150] sm:$0xff]  ;;  %v85_v6 = vld [vmem:[#allocation5 + $0x140] sm:$0xff]  ;;  %s273_s27 = sshll.u32 %s420_s26, 4  ;;  %s274_s27 = int_to_ptr.vmem [resolvable:$true] %s273_s27 }
  0x1f   :  { %v92_v4 = vld [vmem:[#allocation5 + $0x178] sm:$0xff]  ;;  %111 = vmatpush1.msra.mxu0 %v90_v2  ;;  %v89_v7 = vld [vmem:[#allocation5 + $0x160] sm:$0xff]  ;;  %v86_v9 = vld [vmem:[#allocation5 + $0x148] sm:$0xff]  ;;  %v96_v52 = vshrl.u32 %v95_v51, 7  ;;  %p392_p11 = scmp.lt.s32.totalorder %s274_s27, %s274_s27 }
  0x20   :  { %304 = vmatprep.subr.mxu1 %v92_v4  ;;  %112 = vmatprep.subr.mxu0 %v88_v3  ;;  %v84_v8 = vld [vmem:[#allocation5 + $0x138] sm:$0xff]  ;;  %v82_v10 = vld [vmem:[#allocation5 + $0x128] sm:$0xff]  ;;  %v81_v11 = vld [vmem:[#allocation5 + $0x120] sm:$0xff] }
  0x21   :  { %305 = vmatpush3.msra.mxu1 %v92_v4  ;;  %113 = vmatpush1.msra.mxu0 %v87_v5  ;;  %v83_v12 = vld [vmem:[#allocation5 + $0x130] sm:$0xff]  ;;  %v78_v14 = vld [vmem:[#allocation5 + $0x108] sm:$0xff]  ;;  %v80_v15 = vld [vmem:[#allocation5 + $0x118] sm:$0xff]  ;;  %v97_v53 = vsub.s32 0, %v96_v52  ;;  %v101_v55 = vsub.s32 1, %v96_v52  ;;  %v105_v56 = vsub.s32 2, %v96_v52 }
  0x22   :  { %306 = vmatprep.subr.mxu1 %v89_v7  ;;  %114 = vmatprep.subr.mxu0 %v85_v6  ;;  %v79_v13 = vld [vmem:[#allocation5 + $0x110] sm:$0xff]  ;;  %v76_v16 = vld [vmem:[#allocation5 + $0xf8] sm:$0xff]  ;;  %v77_v18 = vld [vmem:[#allocation5 + $0x100] sm:$0xff] }
  0x23   :  { %307 = vmatpush3.msra.mxu1 %v89_v7  ;;  %115 = vmatpush1.msra.mxu0 %v84_v8  ;;  %v75_v17 = vld [vmem:[#allocation5 + $0xf0] sm:$0xff]  ;;  %v73_v19 = vld [vmem:[#allocation5 + $0xe0] sm:$0xff]  ;;  %v72_v20 = vld [vmem:[#allocation5 + $0xd8] sm:$0xff] }
  0x24   :  { %308 = vmatprep.subr.mxu1 %v86_v9  ;;  %116 = vmatprep.subr.mxu0 %v82_v10  ;;  %v74_v21 = vld [vmem:[#allocation5 + $0xe8] sm:$0xff]  ;;  %v69_v23 = vld [vmem:[#allocation5 + $0xc0] sm:$0xff]  ;;  %v71_v24 = vld [vmem:[#allocation5 + $0xd0] sm:$0xff] }
  0x25   :  { %309 = vmatpush3.msra.mxu1 %v86_v9  ;;  %117 = vmatpush1.msra.mxu0 %v81_v11  ;;  %v70_v22 = vld [vmem:[#allocation5 + $0xc8] sm:$0xff]  ;;  %v67_v25 = vld [vmem:[#allocation5 + $0xb0] sm:$0xff]  ;;  %v68_v27 = vld [vmem:[#allocation5 + $0xb8] sm:$0xff] }
  0x26   :  { %310 = vmatprep.subr.mxu1 %v83_v12  ;;  %118 = vmatprep.subr.mxu0 %v79_v13  ;;  %v66_v26 = vld [vmem:[#allocation5 + $0xa8] sm:$0xff]  ;;  %v64_v28 = vld [vmem:[#allocation5 + $0x98] sm:$0xff]  ;;  %v63_v29 = vld [vmem:[#allocation5 + $0x90] sm:$0xff] }
  0x27   :  { %311 = vmatpush3.msra.mxu1 %v83_v12  ;;  %119 = vmatpush1.msra.mxu0 %v78_v14  ;;  %v65_v30 = vld [vmem:[#allocation5 + $0xa0] sm:$0xff]  ;;  %v60_v32 = vld [vmem:[#allocation5 + $0x78] sm:$0xff]  ;;  %v62_v33 = vld [vmem:[#allocation5 + $0x88] sm:$0xff] }
  0x28   :  { %312 = vmatprep.subr.mxu1 %v80_v15  ;;  %120 = vmatprep.subr.mxu0 %v76_v16  ;;  %v61_v31 = vld [vmem:[#allocation5 + $0x80] sm:$0xff]  ;;  %v58_v34 = vld [vmem:[#allocation5 + $0x68] sm:$0xff]  ;;  %v59_v36 = vld [vmem:[#allocation5 + $0x70] sm:$0xff] }
  0x29   :  { %313 = vmatpush3.msra.mxu1 %v80_v15  ;;  %121 = vmatpush1.msra.mxu0 %v75_v17  ;;  %v57_v35 = vld [vmem:[#allocation5 + $0x60] sm:$0xff]  ;;  %v55_v37 = vld [vmem:[#allocation5 + $0x50] sm:$0xff]  ;;  %v54_v38 = vld [vmem:[#allocation5 + $0x48] sm:$0xff] }
  0x2a   :  { %314 = vmatprep.subr.mxu1 %v77_v18  ;;  %122 = vmatprep.subr.mxu0 %v73_v19  ;;  %v56_v39 = vld [vmem:[#allocation5 + $0x58] sm:$0xff]  ;;  %v51_v41 = vld [vmem:[#allocation5 + $0x30] sm:$0xff]  ;;  %v53_v42 = vld [vmem:[#allocation5 + $0x40] sm:$0xff] }
  0x2b   :  { %315 = vmatpush3.msra.mxu1 %v77_v18  ;;  %123 = vmatpush1.msra.mxu0 %v72_v20  ;;  %v52_v40 = vld [vmem:[#allocation5 + $0x38] sm:$0xff]  ;;  %v49_v43 = vld [vmem:[#allocation5 + $0x20] sm:$0xff]  ;;  %v50_v45 = vld [vmem:[#allocation5 + $0x28] sm:$0xff] }
  0x2c   :  { %316 = vmatprep.subr.mxu1 %v74_v21  ;;  %124 = vmatprep.subr.mxu0 %v70_v22  ;;  %v48_v44 = vld [vmem:[#allocation5 + $0x18] sm:$0xff]  ;;  %v46_v46 = vld [vmem:[#allocation5 + $0x8] sm:$0xff]  ;;  %v45_v47 = vld [vmem:[#allocation5] sm:$0xff] }
  0x2d   :  { %317 = vmatpush3.msra.mxu1 %v74_v21  ;;  %125 = vmatpush1.msra.mxu0 %v69_v23  ;;  %v47_v48 = vld [vmem:[#allocation5 + $0x10] sm:$0xff]  ;;  %v44_v50 = vld [vmem:[#allocation2 + $0x8] sm:$0xff] }
  0x2e   :  { %318 = vmatprep.subr.mxu1 %v71_v24  ;;  %126 = vmatprep.subr.mxu0 %v67_v25  ;;  %v43_v49 = vld [vmem:[#allocation2] sm:$0xff] }
  0x2f   :  { %319 = vmatpush3.msra.mxu1 %v71_v24  ;;  %127 = vmatpush1.msra.mxu0 %v66_v26  ;;  %v93_v54 = vld [vmem:[%s463_s2] sm:$0x7]  ;;  %s387_s2 = scalar_lea.vmem %s274_s27, 768 }
  0x30   :  { %320 = vmatprep.subr.mxu1 %v68_v27  ;;  %128 = vmatprep.subr.mxu0 %v64_v28  ;;  %v98_v57 = vrot.slane %v93_v54, %v97_v53  ;;  %v102_v58 = vrot.slane %v93_v54, %v101_v55  ;;  %v106_v59 = vrot.slane %v93_v54, %v105_v56  ;;  %p388_p10 = scmp.ne.s32.totalorder %s274_s27, %s387_s2  ;;  %p393_p12 = scmp.lt.s32.totalorder %s387_s2, %s387_s2 }
  0x31   :  { %321 = vmatpush3.msra.mxu1 %v68_v27  ;;  %129 = vmatpush1.msra.mxu0 %v63_v29 }
  0x32   :  { %322 = vmatprep.subr.mxu1 %v65_v30  ;;  %130 = vmatprep.subr.mxu0 %v61_v31  ;;  %p394_p13 = por %p393_p12, %p392_p11 }
  0x33   :  { %323 = vmatpush3.msra.mxu1 %v65_v30  ;;  %131 = vmatpush1.msra.mxu0 %v60_v32 }
  0x34   :  { %324 = vmatprep.subr.mxu1 %v62_v33  ;;  %132 = vmatprep.subr.mxu0 %v58_v34  ;;  %p395_p0 = pnand %p394_p13, %p388_p10 }
  0x35   :  { %325 = vmatpush3.msra.mxu1 %v62_v33  ;;  %133 = vmatpush1.msra.mxu0 %v57_v35 }
  0x36   :  { %326 = vmatprep.subr.mxu1 %v59_v36  ;;  %134 = vmatprep.subr.mxu0 %v55_v37 }
  0x37   :  { %327 = vmatpush3.msra.mxu1 %v59_v36  ;;  %135 = vmatpush1.msra.mxu0 %v54_v38 }
  0x38   :  { %328 = vmatprep.subr.mxu1 %v56_v39  ;;  %136 = vmatprep.subr.mxu0 %v52_v40 }
  0x39   :  { %329 = vmatpush3.msra.mxu1 %v56_v39  ;;  %137 = vmatpush1.msra.mxu0 %v51_v41 }
  0x3a   :  { %330 = vmatprep.subr.mxu1 %v53_v42  ;;  %138 = vmatprep.subr.mxu0 %v49_v43 }
  0x3b   :  { %331 = vmatpush3.msra.mxu1 %v53_v42  ;;  %139 = vmatpush1.msra.mxu0 %v48_v44 }
  0x3c   :  { %332 = vmatprep.subr.mxu1 %v50_v45  ;;  %140 = vmatprep.subr.mxu0 %v46_v46 }
  0x3d   :  { %333 = vmatpush3.msra.mxu1 %v50_v45  ;;  %141 = vmatpush1.msra.mxu0 %v45_v47 }
  0x3e   :  { %334 = vmatprep.subr.mxu1 %v47_v48  ;;  %175 = vmatmul.mubr.f32.vlgmr.msra.gmra.mxu0 %v43_v49 }
  0x3f   :  { %335 = vmatpush3.msra.mxu1 %v47_v48  ;;  %336 = vmatprep.mubr.f32.mxu1 %v43_v49 }
  0x40   :  { %180 = vmatprep.mubr.f32.mxu0 %v419_v0  ;;  %337 = vmatmul.mubr.f32.vlgmr.msra.gmra.mxu1 %v44_v50 }
  0x42   :  { %181 = vmatmul.mubr.f32.gmra.mxu0 %v44_v50 }
  0xfe   :  { %v176_v60 = vpop.f32.mrf.mxu0 }
  0xff   :  { %v177_v61 = vadd.f32 %v176_v60, %v98_v57 }
 0x100   :  { %v178_v62 = vpop.f32.mrf.mxu0  ;;  %v338_v63 = vpop.f32.mrf.mxu1 }
 0x101   :  { %262 = vst [vmem:[#allocation7] sm:$0xff] %v177_v61  ;;  %v179_v0 = vadd.f32 %v178_v62, %v102_v58  ;;  %v259_v1 = vadd.f32 %v338_v63, %v106_v59 }
 0x102   :  { %v182_v2 = vpop.f32.mrf.mxu0  ;;  %v253_v3 = vpop.f32.mrf.mxu1 }
 0x103   :  { %263 = vst [vmem:[#allocation7 + $0x8] sm:$0xff] %v179_v0  ;;  %267 = vst [vmem:[#allocation7 + $0x28] sm:$0xff] %v259_v1  ;;  %v183_v4 = vadd.f32 %v182_v2, %v98_v57  ;;  %v254_v5 = vadd.f32 %v253_v3, %v106_v59 }
 0x104   :  { %v184_v6 = vpop.f32.mrf.mxu0 }
 0x105   :  { %265 = vst [vmem:[#allocation7 + $0x18] sm:$0xff] %v183_v4  ;;  %264 = vst [vmem:[#allocation7 + $0x10] sm:$0xff] %v254_v5  ;;  %v185_v7 = vadd.f32 %v184_v6, %v102_v58 }
 0x107   :  { %266 = vst [vmem:[#allocation7 + $0x20] sm:$0xff] %v185_v7 }
 0x108   :  { %398 = shalt.err (!%p395_p0)
}
 0x109   :  { %279 = dma.vmem_to_hbm [thread:$0]  %s274_s27, 768, %s464_s3, [#allocation4], %s417_s22, %s417_s22, %s418_s23  }
 0x10a   :  { %411 = dma.done.wait [#allocation4], 768  }
 0x10b   :  { %412 = vsyncadd [#allocation4], 4294966528 }
 0x10c   :  { %283 = vsyncpa [#allocation3], 1 }
 0x10d   :  { %284 = vsyncpa [#allocation6], 1 }
 0x10e   :  { %285 = vsyncpa [#allocation4], 1 }

</bundles_post_ra>
